<compile_context>
chip_gen: v7x
topology: tpu7x:2x2x1
jax: 0.10.0
libtpu: 0.0.40
codegen_flags: <defaults>
</compile_context>

<pallas_src>
import functools

import numpy as np
import jax
import jax.numpy as jnp
from jax.experimental import pallas as pl
from jax.experimental.pallas import tpu as pltpu


# -----------------------------------------------------------------------------
# Haar reverse filter bank -> 8x8 subband->corner matrix
# (pywt unavailable; 'haar'/'db1' reconstruction filters hardcoded)
# TODO(synk): general pywt wavelets (filter_length > 2) need an overlapping-tap
#             grouped conv_transpose3d; only Haar is implemented here.
# -----------------------------------------------------------------------------
def build_haar_rev_matrix():
    r = 1.0 / np.sqrt(2.0)
    rec_lo = np.array([r, r], dtype=np.float32)
    rec_hi = np.array([r, -r], dtype=np.float32)
    g = np.stack([rec_lo, rec_hi], axis=0)  # g[band_bit, tap]
    # Subband s = 4*a + 2*b + c (lo/hi along D,H,W); output corner o = 4*kd+2*kh+kw
    M = np.zeros((8, 8), dtype=np.float32)
    for s in range(8):
        sa, sb, sc = (s >> 2) & 1, (s >> 1) & 1, s & 1
        for o in range(8):
            oa, ob, oc = (o >> 2) & 1, (o >> 1) & 1, o & 1
            M[o, s] = g[sa, oa] * g[sb, ob] * g[sc, oc]
    return M


# -----------------------------------------------------------------------------
# Pallas kernel 1: one inverse wavelet level.  For Haar (stride 2, kernel 2, no
# tap overlap) the grouped conv_transpose3d is a block-diagonal matmul over the
# fused (channel, subband) axis followed by a 2x2x2 interleave.  The low and
# high coefficient tensors are fed separately (no concatenate): two dots with
# kron(I_C, M[:, :1]) and kron(I_C, M[:, 1:]), summed in the kernel.
# -----------------------------------------------------------------------------
def _wavelet_decode_kernel(bdl_ref, bdh_ref, lo_ref, hi_ref, o_ref):
    o_ref[...] = (
        jnp.dot(bdl_ref[...], lo_ref[...], preferred_element_type=jnp.float32)
        + jnp.dot(bdh_ref[...], hi_ref[...], preferred_element_type=jnp.float32))


def wavelet_decode_level(restored, high, BD_lo, BD_hi, max_tile=8192):
    # restored: (C, d, h, w), high: (C, 7, d, h, w) -> (C, 2d, 2h, 2w)
    C, d, h, w = restored.shape
    n = d * h * w
    K = 8 * C
    lo_mat = restored.reshape(C, n)       # free reshape, row = c
    hi_mat = high.reshape(7 * C, n)       # free reshape, row = c*7 + (s-1)

    if n <= max_tile:
        tile, n_pad = n, n                # single full block, no padding
    else:
        tile = None
        for cand in range(max_tile - max_tile % 128, 127, -128):
            if n % cand == 0:
                tile = cand
                break
        if tile is None:
            tile = max_tile - max_tile % 128
        n_pad = -(-n // tile) * tile
        if n_pad != n:
            lo_mat = jnp.pad(lo_mat, ((0, 0), (0, n_pad - n)))
            hi_mat = jnp.pad(hi_mat, ((0, 0), (0, n_pad - n)))

    out_mat = pl.pallas_call(
        _wavelet_decode_kernel,
        out_shape=jax.ShapeDtypeStruct((K, n_pad), jnp.float32),
        grid=(n_pad // tile,),
        in_specs=[pl.BlockSpec((K, C), lambda i: (0, 0)),
                  pl.BlockSpec((K, 7 * C), lambda i: (0, 0)),
                  pl.BlockSpec((C, tile), lambda i: (0, i)),
                  pl.BlockSpec((7 * C, tile), lambda i: (0, i))],
        out_specs=pl.BlockSpec((K, tile), lambda i: (0, i)),
        compiler_params=pltpu.CompilerParams(
            dimension_semantics=("parallel",)),
    )(BD_lo, BD_hi, lo_mat, hi_mat)

    # TODO(synk): fuse the 2x2x2 corner interleave (and unpad) into the Pallas
    #             output instead of leaving it as XLA transpose glue.
    out8 = out_mat[:, :n].reshape(C, 2, 2, 2, d, h, w)  # (c, a, b, e, i, j, k)
    vol = out8.transpose(0, 4, 1, 5, 2, 6, 3).reshape(C, 2 * d, 2 * h, 2 * w)
    return vol


def unpad_to_shape(vol, target_shape):
    # mirrors _WaveletFilterNd._unpad_for_reverse (no-op for even Haar shapes)
    cur = np.asarray(vol.shape[1:])
    diff = cur - np.asarray(target_shape)
    slices = [slice(None)]
    for dd in diff:
        lo = int(np.floor(dd / 2.0))
        hi = -int(np.ceil(dd / 2.0)) or None
        slices.append(slice(lo, hi))
    return vol[tuple(slices)]


# -----------------------------------------------------------------------------
# Pallas kernel 2: trilinear grid_sample (align_corners=False, zeros padding).
# Separable formulation with the volume laid out as (D*C, H*W), row = z*C + c:
#   p   = vol_slab @ syx                      (KZ*C, TN)   one MXU matmul
#   out += sel @ (sz * p)                     (C, TN)      fold z rows -> channels
# syx (HW, TN) is the per-point-tile tent weight matrix (built once per tile),
# sz the per-row z tent weight, sel = kron(ones(1,KZ), I_C) a constant.
# Resident volumes: one z slab, constant block index -> fetched once from HBM.
# -----------------------------------------------------------------------------
def _grid_sample_kernel(coords_ref, vol_ref, sel_ref, out_ref, syx_ref,
                        *, D, H, W, KZ, C):
    j = pl.program_id(1)
    HW = H * W
    TN = coords_ref.shape[1]

    co = coords_ref[...]                        # (3, TN), lane-dense along points
    ix = ((co[0:1, :] + 1.0) * W - 1.0) * 0.5
    iy = ((co[1:2, :] + 1.0) * H - 1.0) * 0.5
    iz = ((co[2:3, :] + 1.0) * D - 1.0) * 0.5

    @pl.when(j == 0)
    def _():
        # Separable (y, x) tent weights, built once per point tile.  Voxels
        # farther than 1 from the sample (incl. all out-of-range corners) get
        # weight 0, so zeros padding falls out for free.
        # TODO(synk): build via (H,TN) x (W,TN) outer product to cut the VALU
        #             cost ~5x (needs a W%8-safe reshape path).
        r = jax.lax.broadcasted_iota(jnp.int32, (HW, TN), 0)
        y_i = r // W
        x_i = r - y_i * W
        wy = jnp.maximum(0.0, 1.0 - jnp.abs(y_i.astype(jnp.float32) - iy))
        wx = jnp.maximum(0.0, 1.0 - jnp.abs(x_i.astype(jnp.float32) - ix))
        syx_ref[...] = wy * wx
        out_ref[...] = jnp.zeros_like(out_ref)

    # One big MXU matmul over all KZ z-slices of the slab (M = KZ*C rows).
    # TODO(synk): feed bf16 vol/syx to the MXU on v6e/v7x once looser
    #             tolerances are acceptable (weight math stays f32).
    p = jnp.dot(vol_ref[...], syx_ref[...],
                preferred_element_type=jnp.float32)          # (KZ*C, TN)

    # z tent weight per row (row k -> z = j*KZ + k//C), then fold onto channels.
    rk = jax.lax.broadcasted_iota(jnp.int32, (KZ * C, TN), 0)
    z_f = (j * KZ + rk // C).astype(jnp.float32)
    sz = jnp.maximum(0.0, 1.0 - jnp.abs(z_f - iz))           # (KZ*C, TN)

    out_ref[...] += jnp.dot(sel_ref[...], sz * p,
                            preferred_element_type=jnp.float32)  # (C, TN)


def grid_sample_pallas(vol, coords, *, slab_budget=8 << 20, syx_budget=4 << 20,
                       pref_tile_n=1024):
    # vol: (C, D, H, W) f32; coords: (N, 3) in [-1, 1] -> (N, C)
    C, D, H, W = vol.shape
    HW = H * W
    N = coords.shape[0]

    # ---- point tile (lane dim) ----------------------------------------------
    tile_n = pref_tile_n
    max_by_syx = max(128, (syx_budget // (4 * HW)) // 128 * 128)
    tile_n = min(tile_n, max_by_syx)
    n128 = -(-N // 128) * 128
    if n128 >= 256:
        # keep >=2 point tiles so both TensorCores get work on v7x
        tile_n = min(tile_n, max(128, (n128 // 2) // 128 * 128))
    else:
        tile_n = 128
    n_pad = -(-N // tile_n) * tile_n

    # ---- z slab: resident volume when it fits, streamed otherwise ------------
    valid = [k for k in range(1, D + 1)
             if D % k == 0 and ((k * C) % 8 == 0 or k == D)]
    fitting = [k for k in valid if k * C * HW * 4 <= slab_budget]
    KZ = max(fitting) if fitting else min(valid)
    Z = D // KZ

    coords_t = jnp.pad(coords.astype(jnp.float32),
                       ((0, n_pad - N), (0, 0))).T                  # (3, n_pad)
    vol2d = vol.astype(jnp.float32).transpose(1, 0, 2, 3).reshape(D * C, HW)
    sel = jnp.asarray(np.tile(np.eye(C, dtype=np.float32), (1, KZ)))  # (C, KZ*C)

    # VMEM budget: 2x vol slab (double buffer) + syx scratch + small blocks.
    # TODO(synk): tile the H*W contraction for very large H*W (syx > VMEM).
    slab_bytes = KZ * C * HW * 4
    est = (2 * slab_bytes + HW * tile_n * 4 + 2 * 3 * tile_n * 4
           + 2 * C * tile_n * 4 + 2 * C * KZ * C * 4)
    vmem_limit = None if est <= (12 << 20) else int(est * 1.5) + (4 << 20)

    kernel = functools.partial(_grid_sample_kernel, D=D, H=H, W=W, KZ=KZ, C=C)
    out = pl.pallas_call(
        kernel,
        out_shape=jax.ShapeDtypeStruct((C, n_pad), jnp.float32),
        grid=(n_pad // tile_n, Z),
        in_specs=[pl.BlockSpec((3, tile_n), lambda i, j: (0, i)),
                  # block index constant when Z == 1 -> volume fetched once
                  pl.BlockSpec((KZ * C, HW), lambda i, j: (j, 0)),
                  pl.BlockSpec((C, KZ * C), lambda i, j: (0, 0))],
        out_specs=pl.BlockSpec((C, tile_n), lambda i, j: (0, i)),
        scratch_shapes=[pltpu.VMEM((HW, tile_n), jnp.float32)],
        compiler_params=pltpu.CompilerParams(
            dimension_semantics=("parallel", "arbitrary"),
            vmem_limit_bytes=vmem_limit),
    )(coords_t, vol2d, sel)
    return out[:, :N].T                                              # (N, C)


# -----------------------------------------------------------------------------
# Module equivalent
# -----------------------------------------------------------------------------
class MultilevelVolumeFeaturesPallas:
    def __init__(self, shapes, features):
        assert len(features) >= 1 and features[0].ndim == 4
        for f in features[1:]:
            assert f.ndim == 5 and f.shape[1] == 7 and f.shape[0] == features[0].shape[0]
        self.shapes = np.asarray(shapes, dtype=int)
        assert len(self.shapes) == len(features) - 1 and self.shapes.shape[-1] == 3
        self.features = [jnp.asarray(f, jnp.float32) for f in features]
        C = features[0].shape[0]
        M = build_haar_rev_matrix()
        self.M = jnp.asarray(M)                                            # 8x8 (reference)
        eye = np.eye(C, dtype=np.float32)
        self.BD_lo = jnp.asarray(np.kron(eye, M[:, :1]))                   # (8C, C)
        self.BD_hi = jnp.asarray(np.kron(eye, M[:, 1:]))                   # (8C, 7C)

    def decode_volume(self):
        restored = self.features[0]
        for high, shape in zip(self.features[1:], self.shapes):
            restored = wavelet_decode_level(restored, high, self.BD_lo, self.BD_hi)
            restored = unpad_to_shape(restored, shape)
        return restored  # (C, D, H, W)

    def __call__(self, x):
        vol = self.decode_volume()
        return grid_sample_pallas(vol, x)  # (N, C)


# -----------------------------------------------------------------------------
# Pure-JAX reference for correctness checking
# -----------------------------------------------------------------------------
def ref_forward(model, x):
    restored = model.features[0]
    for high, shape in zip(model.features[1:], model.shapes):
        coeff = jnp.concatenate([restored[:, None], high], axis=1)
        C, _, d, h, w = coeff.shape
        out8 = jnp.einsum('os,csdhw->codhw', model.M, coeff)
        restored = out8.reshape(C, 2, 2, 2, d, h, w).transpose(
            0, 4, 1, 5, 2, 6, 3).reshape(C, 2 * d, 2 * h, 2 * w)
        restored = unpad_to_shape(restored, shape)
    vol = restored
    C, D, H, W = vol.shape
    gx, gy, gz = x[:, 0], x[:, 1], x[:, 2]
    ix = ((gx + 1.0) * W - 1.0) * 0.5
    iy = ((gy + 1.0) * H - 1.0) * 0.5
    iz = ((gz + 1.0) * D - 1.0) * 0.5
    ix0f, iy0f, iz0f = jnp.floor(ix), jnp.floor(iy), jnp.floor(iz)
    fx, fy, fz = ix - ix0f, iy - iy0f, iz - iz0f
    ix0, iy0, iz0 = (v.astype(jnp.int32) for v in (ix0f, iy0f, iz0f))
    out = jnp.zeros((x.shape[0], C), jnp.float32)
    for dz in (0, 1):
        for dy in (0, 1):
            for dx in (0, 1):
                xi, yi, zi = ix0 + dx, iy0 + dy, iz0 + dz
                wx = fx if dx else (1.0 - fx)
                wy = fy if dy else (1.0 - fy)
                wz = fz if dz else (1.0 - fz)
                valid = ((xi >= 0) & (xi < W) & (yi >= 0) & (yi < H)
                         & (zi >= 0) & (zi < D))
                wgt = jnp.where(valid, wx * wy * wz, 0.0)
                vals = vol[:, jnp.clip(zi, 0, D - 1), jnp.clip(yi, 0, H - 1),
                           jnp.clip(xi, 0, W - 1)].T
                out = out + wgt[:, None] * vals
    return out


if __name__ == "__main__":
    key = jax.random.PRNGKey(0)
    k0, k1, k2, k3 = jax.random.split(key, 4)

    C = 4          # out_channels
    base = 4       # coarsest spatial size
    # Two-level decomposition: decoded volume is (C, 16, 16, 16)
    feat0 = jax.random.normal(k0, (C, base, base, base), jnp.float32)
    feat1 = jax.random.normal(k1, (C, 7, base, base, base), jnp.float32) * 0.5
    feat2 = jax.random.normal(k2, (C, 7, 2 * base, 2 * base, 2 * base), jnp.float32) * 0.25
    shapes = np.array([[2 * base] * 3, [4 * base] * 3], dtype=int)

    model = MultilevelVolumeFeaturesPallas(shapes, [feat0, feat1, feat2])

    N = 200
    x = jax.random.uniform(k3, (N, 3), jnp.float32, minval=-1.0, maxval=1.0)

    out = model(x)
    out = jax.block_until_ready(out)
    assert out.shape == (N, C)

    ref = jax.block_until_ready(ref_forward(model, x))
    np.testing.assert_allclose(np.asarray(out), np.asarray(ref),
                               rtol=1e-4, atol=1e-4)

    print("KERNEL_OK")
</pallas_src>

<mosaic_0001>
module attributes {stable_mosaic.version = 11 : i64} {
  func.func @_wavelet_decode_kernel(%arg0: i32, %arg1: memref<32x4xf32, #tpu.memory_space<vmem>>, %arg2: memref<32x28xf32, #tpu.memory_space<vmem>>, %arg3: memref<4x64xf32, #tpu.memory_space<vmem>>, %arg4: memref<28x64xf32, #tpu.memory_space<vmem>>, %arg5: memref<32x64xf32, #tpu.memory_space<vmem>>) attributes {dimension_semantics = [#tpu.dimension_semantics<parallel>], iteration_bounds = array<i64: 1>, scalar_prefetch = 0 : i64, scratch_operands = 0 : i64, tpu.core_type = #tpu.core_type<tc>, window_params = [{pipeline_mode = #tpu.pipeline_mode<synchronous>, transform_indices = @transform_0, window_bounds = array<i64: 32, 4>}, {pipeline_mode = #tpu.pipeline_mode<synchronous>, transform_indices = @transform_1, window_bounds = array<i64: 32, 28>}, {transform_indices = @transform_2, window_bounds = array<i64: 4, 64>}, {transform_indices = @transform_3, window_bounds = array<i64: 28, 64>}, {transform_indices = @transform_4, window_bounds = array<i64: 32, 64>}]} {
    %c0 = arith.constant 0 : index
    %c0_0 = arith.constant 0 : index
    %0 = vector.load %arg1[%c0, %c0_0] : memref<32x4xf32, #tpu.memory_space<vmem>>, vector<32x4xf32>
    %c0_1 = arith.constant 0 : index
    %c0_2 = arith.constant 0 : index
    %1 = vector.load %arg3[%c0_1, %c0_2] : memref<4x64xf32, #tpu.memory_space<vmem>>, vector<4x64xf32>
    %cst = arith.constant dense<0.000000e+00> : vector<32x64xf32>
    %2 = tpu.matmul %0, %1, %cst {dimension_numbers = #tpu.dot_dimension_numbers<[1], [0], [0], [1], [0, 0, 1, 1], [], []>} : vector<32x4xf32>, vector<4x64xf32>, vector<32x64xf32> -> vector<32x64xf32>
    %c0_3 = arith.constant 0 : index
    %c0_4 = arith.constant 0 : index
    %3 = vector.load %arg2[%c0_3, %c0_4] : memref<32x28xf32, #tpu.memory_space<vmem>>, vector<32x28xf32>
    %c0_5 = arith.constant 0 : index
    %c0_6 = arith.constant 0 : index
    %4 = vector.load %arg4[%c0_5, %c0_6] : memref<28x64xf32, #tpu.memory_space<vmem>>, vector<28x64xf32>
    %cst_7 = arith.constant dense<0.000000e+00> : vector<32x64xf32>
    %5 = tpu.matmul %3, %4, %cst_7 {dimension_numbers = #tpu.dot_dimension_numbers<[1], [0], [0], [1], [0, 0, 1, 1], [], []>} : vector<32x28xf32>, vector<28x64xf32>, vector<32x64xf32> -> vector<32x64xf32>
    %6 = arith.addf %2, %5 : vector<32x64xf32>
    %c0_8 = arith.constant 0 : index
    %c0_9 = arith.constant 0 : index
    %7 = vector.load %arg5[%c0_8, %c0_9] : memref<32x64xf32, #tpu.memory_space<vmem>>, vector<32x64xf32>
    tpu.vector_store %arg5[%c0_8, %c0_9], %6 {strides = array<i32>} : memref<32x64xf32, #tpu.memory_space<vmem>>, vector<32x64xf32>,
    return
  }
  func.func @transform_0(%arg0: i32) -> (i32, i32) {
    %c0_i32 = arith.constant 0 : i32
    %c0_i32_0 = arith.constant 0 : i32
    %c0_i32_1 = arith.constant 0 : i32
    return %c0_i32, %c0_i32_0 : i32, i32
  }
  func.func @transform_1(%arg0: i32) -> (i32, i32) {
    %c0_i32 = arith.constant 0 : i32
    %c0_i32_0 = arith.constant 0 : i32
    %c0_i32_1 = arith.constant 0 : i32
    return %c0_i32, %c0_i32_0 : i32, i32
  }
  func.func @transform_2(%arg0: i32) -> (i32, i32) {
    %c0_i32 = arith.constant 0 : i32
    %c0_i32_0 = arith.constant 0 : i32
    return %c0_i32, %arg0 : i32, i32
  }
  func.func @transform_3(%arg0: i32) -> (i32, i32) {
    %c0_i32 = arith.constant 0 : i32
    %c0_i32_0 = arith.constant 0 : i32
    return %c0_i32, %arg0 : i32, i32
  }
  func.func @transform_4(%arg0: i32) -> (i32, i32) {
    %c0_i32 = arith.constant 0 : i32
    %c0_i32_0 = arith.constant 0 : i32
    return %c0_i32, %arg0 : i32, i32
  }
}

</mosaic_0001>

<bundles_post_ra>
// kernel: tpu_custom_call.1
= control target key start
LH: loop header
LB: loop body
LE: loop exit
PB: predicated region body
PF: predicated region fallthrough
CT: control target
= control target key end

     0   :  { %9 = vsyncpa [#allocation3], 0  ;;  %s480_s0 = inlined_call_operand.vmem [shape: f32[32,4], index: 0, kind: input, shape index: {}]   ;;  %s481_s1 = inlined_call_operand.vmem [shape: f32[32,28], index: 1, kind: input, shape index: {}]   ;;  %s482_s2 = inlined_call_operand.vmem [shape: f32[4,64], index: 2, kind: input, shape index: {}]   ;;  %s483_s3 = inlined_call_operand.hbm [shape: f32[28,64], index: 3, kind: input, shape index: {}]   ;;  %s484_s4 = inlined_call_operand.hbm [shape: f32[32,64], index: 4, kind: output, shape index: {}]  }
   0x1   :  { %10 = vsyncpa [#allocation4], 0  ;;  %s382_s15 = smov [#allocation2]   ;;  %s334_s19 = scalar_lea.hbm %s483_s3, 512 }
   0x2   :  { %s22_s16 = sshll.u32 %s382_s15, 4  ;;  %p335_p0 = scmp.ne.s32.totalorder %s483_s3, %s334_s19  ;;  %s23_s16 = int_to_ptr.vmem [resolvable:$true] %s22_s16 }
   0x3   :  { %p338_p1 = scmp.lt.u32.totalorder %s334_s19, %s483_s3 }
   0x5   :  { %p340_p2 = pnand %p338_p1, %p335_p0 }
   0x7   :  { %343 = shalt.err (!%p340_p2)
}
   0x8   :  { %s344_s24 = scalar_lea.vmem %s23_s16, 512  ;;  %p349_p4 = scmp.lt.s32.totalorder %s23_s16, %s23_s16 }
   0x9   :  { %p345_p3 = scmp.ne.s32.totalorder %s23_s16, %s344_s24  ;;  %p350_p5 = scmp.lt.s32.totalorder %s344_s24, %s344_s24 }
   0xb   :  { %p351_p6 = por %p350_p5, %p349_p4 }
   0xd   :  { %p352_p7 = pnand %p351_p6, %p345_p3 }
   0xf   :  { %355 = shalt.err (!%p352_p7)
}
  0x10   :  { %s383_s25 = smov 128   ;;  %s384_s26 = smov 8  }
  0x11   :  { %28 = dma.hbm_to_vmem [thread:$0]  %s483_s3, 512, %s23_s16, [#allocation3], %s383_s25, %s383_s25, %s384_s26  }
  0x12   :  { %378 = dma.done.wait [#allocation3], 512  }
  0x13   :  { %379 = vsyncadd [#allocation3], 4294966784  ;;  %vm58_vm0 = vcmask 1043456   ;;  %vm147_vm1 = vcmask 31744   ;;  %v41_v0 = vld [vmem:[#allocation2] sm:$0xff]  ;;  %v42_v1 = vld [vmem:[#allocation2 + $0x8] sm:$0xff] }
  0x14   :  { %v43_v2 = vld [vmem:[#allocation2 + $0x10] sm:$0xff]  ;;  %v315_v3 = vpack.c.bf16 %v42_v1, %v41_v0  ;;  %v44_v4 = vld [vmem:[#allocation2 + $0x18] sm:$0xf]  ;;  %v36_v5 = vld [vmem:[%s482_s2] sm:$0xf]  ;;  %vm45_vm2 = vcmask 228352  }
  0x15   :  { %v32_v6 = vld [vmem:[%s480_s0] sm:$0xff]  ;;  %v319_v7 = vpack.c.bf16 %v44_v4, %v43_v2  ;;  %vm385_vm3 = vmmov 1   ;;  %307 = vmatprep.subr.msk.mxu0 %vm58_vm0, %v36_v5  ;;  %v33_v9 = vld [vmem:[%s480_s0 + $0x8] sm:$0xff]  ;;  %v34_v10 = vld [vmem:[%s480_s0 + $0x10] sm:$0xff]  ;;  %vm248_vm5 = vcmask 523264  }
  0x16   :  { %vm320_vm4 = vmpackc.low %vm58_vm0, %vm385_vm3  ;;  %309 = vmatprep.mubr.msk.f32.mxu0 %vm147_vm1, %v32_v6  ;;  %v37_v8 = vld [vmem:[%s481_s1] sm:$0xff]  ;;  %316 = vmatprep.subr.bf16.mxu1 %v315_v3  ;;  %v35_v11 = vld [vmem:[%s480_s0 + $0x18] sm:$0xff]  ;;  %s386_s0 = smov [#allocation5]  }
  0x17   :  { %308 = vmatpush3.msk.msra.mxu0 %vm58_vm0, %v36_v5  ;;  %318 = vmatpush3.bf16.msra.mxu1 %v315_v3  ;;  %v38_v12 = vld [vmem:[%s481_s1 + $0x8] sm:$0xff]  ;;  %v39_v13 = vld [vmem:[%s481_s1 + $0x10] sm:$0xff]  ;;  %v40_v14 = vld [vmem:[%s481_s1 + $0x18] sm:$0xff]  ;;  %s258_s19 = sshll.u32 %s386_s0, 4  ;;  %s259_s19 = int_to_ptr.vmem [resolvable:$true] %s258_s19 }
  0x18   :  { %301 = vmatprep.mubr.msk.f32.mxu1 %vm45_vm2, %v37_v8  ;;  %321 = vmatprep.subr.msk.bf16.mxu1 %vm320_vm4, %v319_v7  ;;  %s356_s1 = scalar_lea.vmem %s259_s19, 512  ;;  %p361_p9 = scmp.lt.s32.totalorder %s259_s19, %s259_s19 }
  0x19   :  { %310 = vmatmul.mubr.msk.f32.vlgmr.msra.gmra.mrb[0].mxu0 %vm147_vm1, %v33_v9  ;;  %p357_p8 = scmp.ne.s32.totalorder %s259_s19, %s356_s1  ;;  %p362_p10 = scmp.lt.s32.totalorder %s356_s1, %s356_s1 }
  0x1a   :  { %312 = vmatprep.mubr.msk.f32.mxu0 %vm147_vm1, %v34_v10 }
  0x1b   :  { %324 = vmatpush3.bf16.msk.msra.mxu1 %vm320_vm4, %v319_v7  ;;  %p363_p11 = por %p362_p10, %p361_p9 }
  0x1d   :  { %313 = vmatmul.mubr.msk.f32.gmra.mrb[2].mxu0 %vm147_vm1, %v35_v11  ;;  %p364_p12 = pnand %p363_p11, %p357_p8 }
  0x1e   :  { %302 = vmatmul.mubr.msk.f32.vlgmr.msra.gmra.mrb[0].mxu1 %vm45_vm2, %v38_v12 }
  0x1f   :  { %304 = vmatprep.mubr.msk.f32.mxu1 %vm45_vm2, %v39_v13 }
  0x22   :  { %305 = vmatmul.mubr.msk.f32.gmra.mrb[2].mxu1 %vm45_vm2, %v40_v14 }
  0xec   :  { %v311_v15 = vpop.f32.mrb[0].mxu0 }
  0xed   :  { %v229_v16 = vpop.f32.mrb[1].mxu0 }
  0xf0   :  { %v314_v17 = vpop.f32.mrb[2].mxu0 }
  0xf1   :  { %v239_v18 = vpop.f32.mrb[3].mxu0  ;;  %v303_v19 = vpop.f32.mrb[0].mxu1 }
  0xf2   :  { %v235_v20 = vadd.f32 %v311_v15, %v303_v19  ;;  %v128_v21 = vpop.f32.mrb[1].mxu1 }
  0xf3   :  { %v230_v22 = vadd.f32 %v229_v16, %v128_v21 }
  0xf4   :  { %250 = vst.msk [vmem:[#allocation5 + $0x8] sm:$0xff] %vm248_vm5, %v235_v20 }
  0xf5   :  { %249 = vst.msk [vmem:[#allocation5] sm:$0xff] %vm248_vm5, %v230_v22  ;;  %v306_v23 = vpop.f32.mrb[2].mxu1 }
  0xf6   :  { %v245_v24 = vadd.f32 %v314_v17, %v306_v23  ;;  %v138_v25 = vpop.f32.mrb[3].mxu1 }
  0xf7   :  { %v240_v26 = vadd.f32 %v239_v18, %v138_v25 }
  0xf8   :  { %252 = vst.msk [vmem:[#allocation5 + $0x18] sm:$0xff] %vm248_vm5, %v245_v24 }
  0xf9   :  { %251 = vst.msk [vmem:[#allocation5 + $0x10] sm:$0xff] %vm248_vm5, %v240_v26 }
  0xfa   :  { %367 = shalt.err (!%p364_p12)
}
  0xfb   :  { %s368_s22 = scalar_lea.hbm %s484_s4, 512 }
  0xfc   :  { %p369_p13 = scmp.ne.s32.totalorder %s484_s4, %s368_s22  ;;  %p372_p0 = scmp.lt.u32.totalorder %s368_s22, %s484_s4 }
  0xfe   :  { %p374_p1 = pnand %p372_p0, %p369_p13 }
 0x100   :  { %377 = shalt.err (!%p374_p1)
}
 0x101   :  { %264 = dma.vmem_to_hbm [thread:$0]  %s259_s19, 512, %s484_s4, [#allocation4], %s383_s25, %s383_s25, %s384_s26  }
 0x102   :  { %380 = dma.done.wait [#allocation4], 512  }
 0x103   :  { %381 = vsyncadd [#allocation4], 4294966784 }
 0x104   :  { %268 = vsyncpa [#allocation3], 1 }
 0x105   :  { %269 = vsyncpa [#allocation4], 1 }

</bundles_post_ra>
